<compile_context>
chip_gen: v7x
topology: tpu7x:2x2x1
jax: 0.10.0
libtpu: 0.0.40
codegen_flags: <defaults>
</compile_context>

<pallas_src>
import functools

import jax
import jax.numpy as jnp
from jax.experimental import pallas as pl
from jax.experimental.pallas import tpu as pltpu


def _round_up(x, m):
    return ((x + m - 1) // m) * m


def _pick_block_batch(n, cin, g, l, m_pad, k, vmem_budget_bytes=24 << 20):
    """Images per grid step: largest divisor of n that fits a conservative VMEM
    budget (safe on v7x's 32 MiB scoped VMEM) while keeping the grid >= 2 so
    megacore sharding still splits work."""
    # per-image VMEM: double-buffered input block + double-buffered output
    # block + bf16 patch columns.
    per_img = (2 * cin * l * 4            # x block (f32), 2 buffers
               + 2 * (cin + g) * m_pad * 4  # out block (f32), 2 buffers
               + k * k * cin * m_pad * 2)   # bf16 patch scratch columns
    cap = max(1, vmem_budget_bytes // per_img)
    best = 1
    for bt in range(1, min(n, cap) + 1):
        if n % bt:
            continue
        if n // bt >= 2 or n == 1:
            best = bt
    return best


# -----------------------------------------------------------------------------
# Pallas kernel: fused conv(k x k, 'same') + bias + ReLU + channel concat,
# Bt images per grid step, one GEMM per step.
# -----------------------------------------------------------------------------
def _make_dense_kernel(x_ref, w_ref, b_ref, out_ref, patches_ref, *,
                       bt, cin, ksize, wp, m_pad):
    """
    x_ref:       (Bt, Cin, L)          f32  zero-padded images, (Hp*Wp) flat on lanes
    w_ref:       (G, K*K*Cin)          bf16 conv weights, index = (ki*K + kj)*Cin + c
    b_ref:       (G, 1)                f32  bias
    out_ref:     (Bt, Cin+G, Mpad)     f32  flat output: [x passthrough ; relu(conv)+b]
    patches_ref: (K*K*Cin, Bt*Mpad)    bf16 in-VMEM im2col matrix (cast-on-copy)
    """
    pad = (ksize - 1) // 2
    g = w_ref.shape[0]
    c_off = pad * wp + pad  # centre-tap offset in the flat padded image

    # --- fused im2col (VMEM only) + exact f32 passthrough --------------------
    for b in range(bt):
        col0 = b * m_pad
        # torch.cat passthrough: bit-exact f32 copy of x straight from x_ref
        # (not via the bf16 patch matrix).
        out_ref[b, 0:cin, :] = x_ref[b, :, c_off:c_off + m_pad]
        for ki in range(ksize):
            # One lane-window load per (image, row-tap); the kj taps are
            # vreg-level shifts of this loaded value.
            row = x_ref[b, :, ki * wp: ki * wp + m_pad + (ksize - 1)]
            for kj in range(ksize):
                t = ki * ksize + kj
                patches_ref[t * cin:(t + 1) * cin, col0:col0 + m_pad] = (
                    row[:, kj:kj + m_pad].astype(jnp.bfloat16))

    # --- single MXU GEMM over all Bt images ----------------------------------
    # (G, K*K*Cin) @ (K*K*Cin, Bt*Mpad), bf16 operands, f32 accumulation;
    # bias + ReLU fused in the epilogue.
    conv = jnp.dot(w_ref[...], patches_ref[...],
                   preferred_element_type=jnp.float32)
    conv = jnp.maximum(conv + b_ref[...], 0.0)

    # --- fused torch.cat((x, out), dim=1): conv channels ----------------------
    for b in range(bt):
        out_ref[b, cin:cin + g, :] = (
            conv[:, b * m_pad:(b + 1) * m_pad].astype(out_ref.dtype))


# -----------------------------------------------------------------------------
# Wrapper
# -----------------------------------------------------------------------------
def make_dense_forward(x, weight, bias, *, block_batch=None):
    """MakeDense.forward.

    x:      (N, Cin, H, W) f32   (NCHW, PyTorch convention)
    weight: (G, Cin, K, K) f32   (OIHW, PyTorch Conv2d weight)
    bias:   (G,)           f32
    returns (N, Cin+G, H, W) f32 == cat(x, relu(conv2d(x, weight, bias, same)), 1)
    """
    n, cin, h, w = x.shape
    g, cin_w, kh, kw = weight.shape
    assert cin == cin_w and kh == kw, (weight.shape, x.shape)
    k = kh
    pad = (k - 1) // 2
    hp, wp = h + 2 * pad, w + 2 * pad
    m = h * wp                                  # valid flat output length
    m_pad = _round_up(m, 128)                   # lane-dense (multiple-of-128) block
    # Lane-padded flat input length; must cover the farthest in-kernel read
    # (last tap of the last image row) AND the whole padded image.
    l = _round_up((k - 1) * wp + m_pad + (k - 1), 128)
    assert l >= (k - 1) * wp + m_pad + (k - 1), "input block too short for taps"
    assert l >= hp * wp, "input block too short for the padded image"
    # Note: patch-row offsets are t*cin; cin being a multiple of 8 keeps those
    # stores sublane-aligned (correct either way).

    bt = block_batch or _pick_block_batch(n, cin, g, l, m_pad, k)
    assert n % bt == 0, (n, bt)

    # Pre-pad spatially once, flatten (Hp, Wp) -> Hp*Wp on lanes, zero-pad the
    # tail to L.  (Two jnp.pad's + reshape; XLA fuses these into one copy.)
    xpad = jnp.pad(x, ((0, 0), (0, 0), (pad, pad), (pad, pad)))
    xflat = jnp.pad(xpad.reshape(n, cin, hp * wp),
                    ((0, 0), (0, 0), (0, l - hp * wp)))

    # Reorder weights to the in-kernel patch layout and cast to bf16.
    w2 = jnp.transpose(weight, (0, 2, 3, 1)).reshape(g, k * k * cin)
    w2 = w2.astype(jnp.bfloat16)
    b2 = bias.reshape(g, 1).astype(jnp.float32)

    kernel = functools.partial(_make_dense_kernel, bt=bt, cin=cin, ksize=k,
                               wp=wp, m_pad=m_pad)
    out_flat = pl.pallas_call(
        kernel,
        out_shape=jax.ShapeDtypeStruct((n, cin + g, m_pad), jnp.float32),
        grid_spec=pltpu.PrefetchScalarGridSpec(
            num_scalar_prefetch=0,
            grid=(n // bt,),
            in_specs=[
                pl.BlockSpec((bt, cin, l), lambda i: (i, 0, 0)),
                pl.BlockSpec((g, k * k * cin), lambda i: (0, 0)),
                pl.BlockSpec((g, 1), lambda i: (0, 0)),
            ],
            out_specs=pl.BlockSpec((bt, cin + g, m_pad), lambda i: (i, 0, 0)),
            scratch_shapes=[pltpu.VMEM((k * k * cin, bt * m_pad), jnp.bfloat16)],
        ),
        compiler_params=pltpu.CompilerParams(
            dimension_semantics=("parallel",)),
    )(xflat, w2, b2)

    # Compact: drop the M->Mpad lane padding and the 2*pad garbage columns per
    # row introduced by the flat-window trick.
    out = out_flat[:, :, :m].reshape(n, cin + g, h, wp)[:, :, :, :w]
    return out


# -----------------------------------------------------------------------------
if __name__ == "__main__":
    key = jax.random.PRNGKey(0)
    kx, kw_, kb = jax.random.split(key, 3)

    B, CIN, H, W = 4, 8, 16, 16
    GROWTH, KSIZE = 16, 3

    x = jax.random.normal(kx, (B, CIN, H, W), dtype=jnp.float32)
    weight = 0.1 * jax.random.normal(kw_, (GROWTH, CIN, KSIZE, KSIZE),
                                     dtype=jnp.float32)
    bias = 0.1 * jax.random.normal(kb, (GROWTH,), dtype=jnp.float32)

    fwd = jax.jit(make_dense_forward)
    out = fwd(x, weight, bias)
    out = jax.block_until_ready(out)

    assert out.shape == (B, CIN + GROWTH, H, W), out.shape
    assert bool(jnp.all(jnp.isfinite(out)))

    # Reference (f32 XLA conv); bf16 GEMM operands => loose tolerance on the
    # conv channels, exactness required on the passthrough channels.
    p = (KSIZE - 1) // 2
    ref_conv = jax.lax.conv_general_dilated(
        x, weight, window_strides=(1, 1), padding=((p, p), (p, p)),
        dimension_numbers=("NCHW", "OIHW", "NCHW"))
    ref = jnp.concatenate(
        [x, jnp.maximum(ref_conv + bias[None, :, None, None], 0.0)], axis=1)

    pass_err = float(jnp.max(jnp.abs(out[:, :CIN] - x)))
    conv_err = float(jnp.max(jnp.abs(out[:, CIN:] - ref[:, CIN:])))
    assert pass_err == 0.0, f"passthrough mismatch {pass_err}"
    assert conv_err < 5e-2, f"conv max abs err {conv_err}"

    print("KERNEL_OK")
</pallas_src>

<mosaic_0001>
module attributes {stable_mosaic.version = 11 : i64} {
  func.func @_make_dense_kernel(%arg0: i32, %arg1: memref<2x8x512xf32, #tpu.memory_space<vmem>>, %arg2: memref<16x72xbf16, #tpu.memory_space<vmem>>, %arg3: memref<16x1xf32, #tpu.memory_space<vmem>>, %arg4: memref<2x24x384xf32, #tpu.memory_space<vmem>>, %arg5: memref<72x768xbf16, #tpu.memory_space<vmem>>) attributes {dimension_semantics = [#tpu.dimension_semantics<parallel>], iteration_bounds = array<i64: 2>, scalar_prefetch = 0 : i64, scratch_operands = 1 : i64, tpu.core_type = #tpu.core_type<tc>, window_params = [{transform_indices = @transform_0, window_bounds = array<i64: 2, 8, 512>}, {pipeline_mode = #tpu.pipeline_mode<synchronous>, transform_indices = @transform_1, window_bounds = array<i64: 16, 72>}, {pipeline_mode = #tpu.pipeline_mode<synchronous>, transform_indices = @transform_2, window_bounds = array<i64: 16, 1>}, {transform_indices = @transform_3, window_bounds = array<i64: 2, 24, 384>}]} {
    %c0 = arith.constant 0 : index
    %c0_0 = arith.constant 0 : index
    %c19 = arith.constant 19 : index
    %0 = vector.load %arg1[%c0, %c0_0, %c19] : memref<2x8x512xf32, #tpu.memory_space<vmem>>, vector<1x8x384xf32>
    %1 = vector.shape_cast %0 : vector<1x8x384xf32> to vector<8x384xf32>
    %c0_1 = arith.constant 0 : index
    %c0_2 = arith.constant 0 : index
    %c0_3 = arith.constant 0 : index
    %2 = vector.load %arg4[%c0_1, %c0_2, %c0_3] : memref<2x24x384xf32, #tpu.memory_space<vmem>>, vector<1x8x384xf32>
    %3 = vector.shape_cast %2 : vector<1x8x384xf32> to vector<8x384xf32>
    %4 = vector.shape_cast %1 : vector<8x384xf32> to vector<1x8x384xf32>
    tpu.vector_store %arg4[%c0_1, %c0_2, %c0_3], %4 {strides = array<i32>} : memref<2x24x384xf32, #tpu.memory_space<vmem>>, vector<1x8x384xf32>,
    %c0_4 = arith.constant 0 : index
    %c0_5 = arith.constant 0 : index
    %c0_6 = arith.constant 0 : index
    %5 = vector.load %arg1[%c0_4, %c0_5, %c0_6] : memref<2x8x512xf32, #tpu.memory_space<vmem>>, vector<1x8x386xf32>
    %6 = vector.shape_cast %5 : vector<1x8x386xf32> to vector<8x386xf32>
    %7 = vector.extract_strided_slice %6 {offsets = [0, 0], sizes = [8, 384], strides = [1, 1]} : vector<8x386xf32> to vector<8x384xf32>
    %8 = arith.truncf %7 : vector<8x384xf32> to vector<8x384xbf16>
    %c0_7 = arith.constant 0 : index
    %c0_8 = arith.constant 0 : index
    %9 = vector.load %arg5[%c0_7, %c0_8] : memref<72x768xbf16, #tpu.memory_space<vmem>>, vector<8x384xbf16>
    tpu.vector_store %arg5[%c0_7, %c0_8], %8 {strides = array<i32>} : memref<72x768xbf16, #tpu.memory_space<vmem>>, vector<8x384xbf16>,
    %10 = vector.extract_strided_slice %6 {offsets = [0, 1], sizes = [8, 384], strides = [1, 1]} : vector<8x386xf32> to vector<8x384xf32>
    %11 = arith.truncf %10 : vector<8x384xf32> to vector<8x384xbf16>
    %c8 = arith.constant 8 : index
    %c0_9 = arith.constant 0 : index
    %12 = vector.load %arg5[%c8, %c0_9] : memref<72x768xbf16, #tpu.memory_space<vmem>>, vector<8x384xbf16>
    tpu.vector_store %arg5[%c8, %c0_9], %11 {strides = array<i32>} : memref<72x768xbf16, #tpu.memory_space<vmem>>, vector<8x384xbf16>,
    %13 = vector.extract_strided_slice %6 {offsets = [0, 2], sizes = [8, 384], strides = [1, 1]} : vector<8x386xf32> to vector<8x384xf32>
    %14 = arith.truncf %13 : vector<8x384xf32> to vector<8x384xbf16>
    %c16 = arith.constant 16 : index
    %c0_10 = arith.constant 0 : index
    %15 = vector.load %arg5[%c16, %c0_10] : memref<72x768xbf16, #tpu.memory_space<vmem>>, vector<8x384xbf16>
    tpu.vector_store %arg5[%c16, %c0_10], %14 {strides = array<i32>} : memref<72x768xbf16, #tpu.memory_space<vmem>>, vector<8x384xbf16>,
    %c0_11 = arith.constant 0 : index
    %c0_12 = arith.constant 0 : index
    %c18 = arith.constant 18 : index
    %16 = vector.load %arg1[%c0_11, %c0_12, %c18] : memref<2x8x512xf32, #tpu.memory_space<vmem>>, vector<1x8x386xf32>
    %17 = vector.shape_cast %16 : vector<1x8x386xf32> to vector<8x386xf32>
    %18 = vector.extract_strided_slice %17 {offsets = [0, 0], sizes = [8, 384], strides = [1, 1]} : vector<8x386xf32> to vector<8x384xf32>
    %19 = arith.truncf %18 : vector<8x384xf32> to vector<8x384xbf16>
    %c24 = arith.constant 24 : index
    %c0_13 = arith.constant 0 : index
    %20 = vector.load %arg5[%c24, %c0_13] : memref<72x768xbf16, #tpu.memory_space<vmem>>, vector<8x384xbf16>
    tpu.vector_store %arg5[%c24, %c0_13], %19 {strides = array<i32>} : memref<72x768xbf16, #tpu.memory_space<vmem>>, vector<8x384xbf16>,
    %21 = vector.extract_strided_slice %17 {offsets = [0, 1], sizes = [8, 384], strides = [1, 1]} : vector<8x386xf32> to vector<8x384xf32>
    %22 = arith.truncf %21 : vector<8x384xf32> to vector<8x384xbf16>
    %c32 = arith.constant 32 : index
    %c0_14 = arith.constant 0 : index
    %23 = vector.load %arg5[%c32, %c0_14] : memref<72x768xbf16, #tpu.memory_space<vmem>>, vector<8x384xbf16>
    tpu.vector_store %arg5[%c32, %c0_14], %22 {strides = array<i32>} : memref<72x768xbf16, #tpu.memory_space<vmem>>, vector<8x384xbf16>,
    %24 = vector.extract_strided_slice %17 {offsets = [0, 2], sizes = [8, 384], strides = [1, 1]} : vector<8x386xf32> to vector<8x384xf32>
    %25 = arith.truncf %24 : vector<8x384xf32> to vector<8x384xbf16>
    %c40 = arith.constant 40 : index
    %c0_15 = arith.constant 0 : index
    %26 = vector.load %arg5[%c40, %c0_15] : memref<72x768xbf16, #tpu.memory_space<vmem>>, vector<8x384xbf16>
    tpu.vector_store %arg5[%c40, %c0_15], %25 {strides = array<i32>} : memref<72x768xbf16, #tpu.memory_space<vmem>>, vector<8x384xbf16>,
    %c0_16 = arith.constant 0 : index
    %c0_17 = arith.constant 0 : index
    %c36 = arith.constant 36 : index
    %27 = vector.load %arg1[%c0_16, %c0_17, %c36] : memref<2x8x512xf32, #tpu.memory_space<vmem>>, vector<1x8x386xf32>
    %28 = vector.shape_cast %27 : vector<1x8x386xf32> to vector<8x386xf32>
    %29 = vector.extract_strided_slice %28 {offsets = [0, 0], sizes = [8, 384], strides = [1, 1]} : vector<8x386xf32> to vector<8x384xf32>
    %30 = arith.truncf %29 : vector<8x384xf32> to vector<8x384xbf16>
    %c48 = arith.constant 48 : index
    %c0_18 = arith.constant 0 : index
    %31 = vector.load %arg5[%c48, %c0_18] : memref<72x768xbf16, #tpu.memory_space<vmem>>, vector<8x384xbf16>
    tpu.vector_store %arg5[%c48, %c0_18], %30 {strides = array<i32>} : memref<72x768xbf16, #tpu.memory_space<vmem>>, vector<8x384xbf16>,
    %32 = vector.extract_strided_slice %28 {offsets = [0, 1], sizes = [8, 384], strides = [1, 1]} : vector<8x386xf32> to vector<8x384xf32>
    %33 = arith.truncf %32 : vector<8x384xf32> to vector<8x384xbf16>
    %c56 = arith.constant 56 : index
    %c0_19 = arith.constant 0 : index
    %34 = vector.load %arg5[%c56, %c0_19] : memref<72x768xbf16, #tpu.memory_space<vmem>>, vector<8x384xbf16>
    tpu.vector_store %arg5[%c56, %c0_19], %33 {strides = array<i32>} : memref<72x768xbf16, #tpu.memory_space<vmem>>, vector<8x384xbf16>,
    %35 = vector.extract_strided_slice %28 {offsets = [0, 2], sizes = [8, 384], strides = [1, 1]} : vector<8x386xf32> to vector<8x384xf32>
    %36 = arith.truncf %35 : vector<8x384xf32> to vector<8x384xbf16>
    %c64 = arith.constant 64 : index
    %c0_20 = arith.constant 0 : index
    %37 = vector.load %arg5[%c64, %c0_20] : memref<72x768xbf16, #tpu.memory_space<vmem>>, vector<8x384xbf16>
    tpu.vector_store %arg5[%c64, %c0_20], %36 {strides = array<i32>} : memref<72x768xbf16, #tpu.memory_space<vmem>>, vector<8x384xbf16>,
    %c1 = arith.constant 1 : index
    %c0_21 = arith.constant 0 : index
    %c19_22 = arith.constant 19 : index
    %38 = vector.load %arg1[%c1, %c0_21, %c19_22] : memref<2x8x512xf32, #tpu.memory_space<vmem>>, vector<1x8x384xf32>
    %39 = vector.shape_cast %38 : vector<1x8x384xf32> to vector<8x384xf32>
    %c1_23 = arith.constant 1 : index
    %c0_24 = arith.constant 0 : index
    %c0_25 = arith.constant 0 : index
    %40 = vector.load %arg4[%c1_23, %c0_24, %c0_25] : memref<2x24x384xf32, #tpu.memory_space<vmem>>, vector<1x8x384xf32>
    %41 = vector.shape_cast %40 : vector<1x8x384xf32> to vector<8x384xf32>
    %42 = vector.shape_cast %39 : vector<8x384xf32> to vector<1x8x384xf32>
    tpu.vector_store %arg4[%c1_23, %c0_24, %c0_25], %42 {strides = array<i32>} : memref<2x24x384xf32, #tpu.memory_space<vmem>>, vector<1x8x384xf32>,
    %c1_26 = arith.constant 1 : index
    %c0_27 = arith.constant 0 : index
    %c0_28 = arith.constant 0 : index
    %43 = vector.load %arg1[%c1_26, %c0_27, %c0_28] : memref<2x8x512xf32, #tpu.memory_space<vmem>>, vector<1x8x386xf32>
    %44 = vector.shape_cast %43 : vector<1x8x386xf32> to vector<8x386xf32>
    %45 = vector.extract_strided_slice %44 {offsets = [0, 0], sizes = [8, 384], strides = [1, 1]} : vector<8x386xf32> to vector<8x384xf32>
    %46 = arith.truncf %45 : vector<8x384xf32> to vector<8x384xbf16>
    %c0_29 = arith.constant 0 : index
    %c384 = arith.constant 384 : index
    %47 = vector.load %arg5[%c0_29, %c384] : memref<72x768xbf16, #tpu.memory_space<vmem>>, vector<8x384xbf16>
    tpu.vector_store %arg5[%c0_29, %c384], %46 {strides = array<i32>} : memref<72x768xbf16, #tpu.memory_space<vmem>>, vector<8x384xbf16>,
    %48 = vector.extract_strided_slice %44 {offsets = [0, 1], sizes = [8, 384], strides = [1, 1]} : vector<8x386xf32> to vector<8x384xf32>
    %49 = arith.truncf %48 : vector<8x384xf32> to vector<8x384xbf16>
    %c8_30 = arith.constant 8 : index
    %c384_31 = arith.constant 384 : index
    %50 = vector.load %arg5[%c8_30, %c384_31] : memref<72x768xbf16, #tpu.memory_space<vmem>>, vector<8x384xbf16>
    tpu.vector_store %arg5[%c8_30, %c384_31], %49 {strides = array<i32>} : memref<72x768xbf16, #tpu.memory_space<vmem>>, vector<8x384xbf16>,
    %51 = vector.extract_strided_slice %44 {offsets = [0, 2], sizes = [8, 384], strides = [1, 1]} : vector<8x386xf32> to vector<8x384xf32>
    %52 = arith.truncf %51 : vector<8x384xf32> to vector<8x384xbf16>
    %c16_32 = arith.constant 16 : index
    %c384_33 = arith.constant 384 : index
    %53 = vector.load %arg5[%c16_32, %c384_33] : memref<72x768xbf16, #tpu.memory_space<vmem>>, vector<8x384xbf16>
    tpu.vector_store %arg5[%c16_32, %c384_33], %52 {strides = array<i32>} : memref<72x768xbf16, #tpu.memory_space<vmem>>, vector<8x384xbf16>,
    %c1_34 = arith.constant 1 : index
    %c0_35 = arith.constant 0 : index
    %c18_36 = arith.constant 18 : index
    %54 = vector.load %arg1[%c1_34, %c0_35, %c18_36] : memref<2x8x512xf32, #tpu.memory_space<vmem>>, vector<1x8x386xf32>
    %55 = vector.shape_cast %54 : vector<1x8x386xf32> to vector<8x386xf32>
    %56 = vector.extract_strided_slice %55 {offsets = [0, 0], sizes = [8, 384], strides = [1, 1]} : vector<8x386xf32> to vector<8x384xf32>
    %57 = arith.truncf %56 : vector<8x384xf32> to vector<8x384xbf16>
    %c24_37 = arith.constant 24 : index
    %c384_38 = arith.constant 384 : index
    %58 = vector.load %arg5[%c24_37, %c384_38] : memref<72x768xbf16, #tpu.memory_space<vmem>>, vector<8x384xbf16>
    tpu.vector_store %arg5[%c24_37, %c384_38], %57 {strides = array<i32>} : memref<72x768xbf16, #tpu.memory_space<vmem>>, vector<8x384xbf16>,
    %59 = vector.extract_strided_slice %55 {offsets = [0, 1], sizes = [8, 384], strides = [1, 1]} : vector<8x386xf32> to vector<8x384xf32>
    %60 = arith.truncf %59 : vector<8x384xf32> to vector<8x384xbf16>
    %c32_39 = arith.constant 32 : index
    %c384_40 = arith.constant 384 : index
    %61 = vector.load %arg5[%c32_39, %c384_40] : memref<72x768xbf16, #tpu.memory_space<vmem>>, vector<8x384xbf16>
    tpu.vector_store %arg5[%c32_39, %c384_40], %60 {strides = array<i32>} : memref<72x768xbf16, #tpu.memory_space<vmem>>, vector<8x384xbf16>,
    %62 = vector.extract_strided_slice %55 {offsets = [0, 2], sizes = [8, 384], strides = [1, 1]} : vector<8x386xf32> to vector<8x384xf32>
    %63 = arith.truncf %62 : vector<8x384xf32> to vector<8x384xbf16>
    %c40_41 = arith.constant 40 : index
    %c384_42 = arith.constant 384 : index
    %64 = vector.load %arg5[%c40_41, %c384_42] : memref<72x768xbf16, #tpu.memory_space<vmem>>, vector<8x384xbf16>
    tpu.vector_store %arg5[%c40_41, %c384_42], %63 {strides = array<i32>} : memref<72x768xbf16, #tpu.memory_space<vmem>>, vector<8x384xbf16>,
    %c1_43 = arith.constant 1 : index
    %c0_44 = arith.constant 0 : index
    %c36_45 = arith.constant 36 : index
    %65 = vector.load %arg1[%c1_43, %c0_44, %c36_45] : memref<2x8x512xf32, #tpu.memory_space<vmem>>, vector<1x8x386xf32>
    %66 = vector.shape_cast %65 : vector<1x8x386xf32> to vector<8x386xf32>
    %67 = vector.extract_strided_slice %66 {offsets = [0, 0], sizes = [8, 384], strides = [1, 1]} : vector<8x386xf32> to vector<8x384xf32>
    %68 = arith.truncf %67 : vector<8x384xf32> to vector<8x384xbf16>
    %c48_46 = arith.constant 48 : index
    %c384_47 = arith.constant 384 : index
    %69 = vector.load %arg5[%c48_46, %c384_47] : memref<72x768xbf16, #tpu.memory_space<vmem>>, vector<8x384xbf16>
    tpu.vector_store %arg5[%c48_46, %c384_47], %68 {strides = array<i32>} : memref<72x768xbf16, #tpu.memory_space<vmem>>, vector<8x384xbf16>,
    %70 = vector.extract_strided_slice %66 {offsets = [0, 1], sizes = [8, 384], strides = [1, 1]} : vector<8x386xf32> to vector<8x384xf32>
    %71 = arith.truncf %70 : vector<8x384xf32> to vector<8x384xbf16>
    %c56_48 = arith.constant 56 : index
    %c384_49 = arith.constant 384 : index
    %72 = vector.load %arg5[%c56_48, %c384_49] : memref<72x768xbf16, #tpu.memory_space<vmem>>, vector<8x384xbf16>
    tpu.vector_store %arg5[%c56_48, %c384_49], %71 {strides = array<i32>} : memref<72x768xbf16, #tpu.memory_space<vmem>>, vector<8x384xbf16>,
    %73 = vector.extract_strided_slice %66 {offsets = [0, 2], sizes = [8, 384], strides = [1, 1]} : vector<8x386xf32> to vector<8x384xf32>
    %74 = arith.truncf %73 : vector<8x384xf32> to vector<8x384xbf16>
    %c64_50 = arith.constant 64 : index
    %c384_51 = arith.constant 384 : index
    %75 = vector.load %arg5[%c64_50, %c384_51] : memref<72x768xbf16, #tpu.memory_space<vmem>>, vector<8x384xbf16>
    tpu.vector_store %arg5[%c64_50, %c384_51], %74 {strides = array<i32>} : memref<72x768xbf16, #tpu.memory_space<vmem>>, vector<8x384xbf16>,
    %c0_52 = arith.constant 0 : index
    %c0_53 = arith.constant 0 : index
    %76 = vector.load %arg2[%c0_52, %c0_53] : memref<16x72xbf16, #tpu.memory_space<vmem>>, vector<16x72xbf16>
    %c0_54 = arith.constant 0 : index
    %c0_55 = arith.constant 0 : index
    %77 = vector.load %arg5[%c0_54, %c0_55] : memref<72x768xbf16, #tpu.memory_space<vmem>>, vector<72x768xbf16>
    %cst = arith.constant dense<0.000000e+00> : vector<16x768xf32>
    %78 = tpu.matmul %76, %77, %cst {dimension_numbers = #tpu.dot_dimension_numbers<[1], [0], [0], [1], [0, 0, 1, 1], [], []>} : vector<16x72xbf16>, vector<72x768xbf16>, vector<16x768xf32> -> vector<16x768xf32>
    %c0_56 = arith.constant 0 : index
    %c0_57 = arith.constant 0 : index
    %79 = vector.load %arg3[%c0_56, %c0_57] : memref<16x1xf32, #tpu.memory_space<vmem>>, vector<16x1xf32>
    %80 = vector.broadcast %79 : vector<16x1xf32> to vector<16x768xf32>
    %81 = arith.addf %78, %80 : vector<16x768xf32>
    %cst_58 = arith.constant 0.000000e+00 : f32
    %82 = vector.broadcast %cst_58 : f32 to vector<16x768xf32>
    %83 = arith.maximumf %81, %82 : vector<16x768xf32>
    %84 = vector.extract_strided_slice %83 {offsets = [0, 0], sizes = [16, 384], strides = [1, 1]} : vector<16x768xf32> to vector<16x384xf32>
    %c0_59 = arith.constant 0 : index
    %c8_60 = arith.constant 8 : index
    %c0_61 = arith.constant 0 : index
    %85 = vector.load %arg4[%c0_59, %c8_60, %c0_61] : memref<2x24x384xf32, #tpu.memory_space<vmem>>, vector<1x16x384xf32>
    %86 = vector.shape_cast %85 : vector<1x16x384xf32> to vector<16x384xf32>
    %87 = vector.shape_cast %84 : vector<16x384xf32> to vector<1x16x384xf32>
    tpu.vector_store %arg4[%c0_59, %c8_60, %c0_61], %87 {strides = array<i32>} : memref<2x24x384xf32, #tpu.memory_space<vmem>>, vector<1x16x384xf32>,
    %88 = vector.extract_strided_slice %83 {offsets = [0, 384], sizes = [16, 384], strides = [1, 1]} : vector<16x768xf32> to vector<16x384xf32>
    %c1_62 = arith.constant 1 : index
    %c8_63 = arith.constant 8 : index
    %c0_64 = arith.constant 0 : index
    %89 = vector.load %arg4[%c1_62, %c8_63, %c0_64] : memref<2x24x384xf32, #tpu.memory_space<vmem>>, vector<1x16x384xf32>
    %90 = vector.shape_cast %89 : vector<1x16x384xf32> to vector<16x384xf32>
    %91 = vector.shape_cast %88 : vector<16x384xf32> to vector<1x16x384xf32>
    tpu.vector_store %arg4[%c1_62, %c8_63, %c0_64], %91 {strides = array<i32>} : memref<2x24x384xf32, #tpu.memory_space<vmem>>, vector<1x16x384xf32>,
    return
  }
  func.func @transform_0(%arg0: i32) -> (i32, i32, i32) {
    %c0_i32 = arith.constant 0 : i32
    %c0_i32_0 = arith.constant 0 : i32
    %c0_i32_1 = arith.constant 0 : i32
    return %arg0, %c0_i32, %c0_i32_0 : i32, i32, i32
  }
  func.func @transform_1(%arg0: i32) -> (i32, i32) {
    %c0_i32 = arith.constant 0 : i32
    %c0_i32_0 = arith.constant 0 : i32
    %c0_i32_1 = arith.constant 0 : i32
    return %c0_i32, %c0_i32_0 : i32, i32
  }
  func.func @transform_2(%arg0: i32) -> (i32, i32) {
    %c0_i32 = arith.constant 0 : i32
    %c0_i32_0 = arith.constant 0 : i32
    %c0_i32_1 = arith.constant 0 : i32
    return %c0_i32, %c0_i32_0 : i32, i32
  }
  func.func @transform_3(%arg0: i32) -> (i32, i32, i32) {
    %c0_i32 = arith.constant 0 : i32
    %c0_i32_0 = arith.constant 0 : i32
    %c0_i32_1 = arith.constant 0 : i32
    return %arg0, %c0_i32, %c0_i32_0 : i32, i32, i32
  }
}

</mosaic_0001>

<bundles_post_ra>
// kernel: make_dense_forward.1
= control target key start
LH: loop header
LB: loop body
LE: loop exit
PB: predicated region body
PF: predicated region fallthrough
CT: control target
= control target key end

     0   :  { %s1172_s12 = smov 0   ;;  %s1357_s0 = inlined_call_operand.vmem [shape: f32[4,8,512], index: 0, kind: input, shape index: {}]   ;;  %s1358_s1 = inlined_call_operand.vmem [shape: bf16[16,72], index: 1, kind: input, shape index: {}]   ;;  %s1359_s2 = inlined_call_operand.vmem [shape: f32[16,1], index: 2, kind: input, shape index: {}]   ;;  %s1360_s3 = inlined_call_operand.vmem [shape: f32[4,24,384], index: 3, kind: output, shape index: {}]  }
   0x1 LB: > { %s983_s13 = sadd.s32 4294967295, %s1141_s12   ;;  %p987_p0 = scmp.ge.s32.totalorder %s1141_s12, 1  ;;  %s1141_s12 = sphi %s1172_s12, %s13_s12  }
   0x2   : > { %p139_p1 = scmp.lt.s32.totalorder %s1141_s12, 3 }
   0x4   : > { %p140_p2 = pnand %p987_p0, %p139_p1 }
   0x5   : > { %s988_s14 = sshll.u32 (!%p140_p2), %s983_s13, 1  ;;  %s1143_s19 = smov (!%p140_p2), 126   ;;  %v1151_v14 = vmov (!%p140_p2), 0   ;;  %v598_v15 = vld [vmem:[%s1359_s2 + $0x8] sm:$0xff] (!%p140_p2)  ;;  %v597_v16 = vld [vmem:[%s1359_s2] sm:$0xff] (!%p140_p2)  ;;  %vm235_vm0 = vcmask (!%p140_p2), 1043456  }
   0x6   : > { %143 = sbr.rel (%p140_p2) target bundleno = 432 (0x1b0), region = 32  ;;  %p166_p3 = scmp.lt.s32.totalorder (!%p140_p2), %s988_s14, 3  ;;  %804 = vmatprep.mubr.bf16.mxu0 (!%p140_p2), %v1151_v14  ;;  %847 = vmatprep.mubr.bf16.mxu1 (!%p140_p2), %v1151_v14  ;;  %vm251_vm1 = vcmask (!%p140_p2), 1031168   ;;  %vm237_vm2 = vcmask (!%p140_p2), 1039360   ;;  %vm283_vm3 = vcmask (!%p140_p2), 900096   ;;  %vm196_vm4 = vcmask (!%p140_p2), 891904  }
   0x7   : > { %s1144_s20 = smov (!%p140_p2), 127   ;;  %s1145_s21 = smov (!%p140_p2), 110   ;;  %1105 = vset.pattern.permute.xlu1 (!%p140_p2), %v1151_v14  ;;  %1104 = vset.pattern.permute.xlu0 (!%p140_p2), %v1151_v14  ;;  %vm311_vm5 = vcmask (!%p140_p2), 883712   ;;  %vm343_vm6 = vcmask (!%p140_p2), 752640   ;;  %vm357_vm7 = vcmask (!%p140_p2), 744448   ;;  %vm371_vm8 = vcmask (!%p140_p2), 736256  }
   0x8   : > { %s1146_s22 = smov (!%p140_p2), 109   ;;  %s1147_s23 = smov (!%p140_p2), 108   ;;  %vm749_vm9 = vcmask (!%p140_p2), 588800  }
   0x9   : > { %s1148_s24 = smov (!%p140_p2), 92   ;;  %s1149_s25 = smov (!%p140_p2), 91  }
   0xa   : > { %s1150_s26 = smov (!%p140_p2), 90  }
   0xd   : > { %s1362_s14 = smov (!%p166_p3, %s988_s14), 3 }
   0xe   : > { %s1071_s15 = sshll.u32 %s1362_s14, 5  ;;  %s1086_s6 = smul.u32 72, %s1362_s14 }
   0xf   : > { %s1186_s18 = scalar_lea.vmem %s1357_s0, %s1071_s15 }
  0x10   : > { %v1189_v0 = vld [vmem:[%s1186_s18] sm:$0xff]  ;;  %v1192_v1 = vld [vmem:[%s1186_s18 + $0x8] sm:$0xff]  ;;  %v1195_v2 = vld [vmem:[%s1186_s18 + $0x10] sm:$0xff]  ;;  %s1328_s9 = scalar_lea.vmem %s1360_s3, %s1086_s6 }
  0x11   : > { %v1199_v3 = vpack.c.bf16 %v1192_v1, %v1189_v0  ;;  %v1202_v4 = vld [vmem:[%s1186_s18 + $0x18] sm:$0xff]  ;;  %v1073_v5 = vpack.c.bf16 %v1195_v2, %v1195_v2  ;;  %v1207_v6 = vld [vmem:[%s1186_s18 + $0x30] sm:$0xff]  ;;  %v1007_v8 = vld [vmem:[%s1186_s18 + $0x20] sm:$0xff] }
  0x12   : > { %v1080_v7 = vpack.c.bf16 %v1207_v6, %v1207_v6  ;;  %v1008_v9 = vld [vmem:[%s1186_s18 + $0x28] sm:$0xff]  ;;  %v1074_v10 = vpack.c.bf16 %v1202_v4, %v1195_v2  ;;  %v1010_v12 = vld [vmem:[%s1186_s18 + $0x38] sm:$0xff] }
  0x13   : > { %244 = vrot.lane.b32.xlu1 %v1199_v3, %s1143_s19  ;;  %229 = vrot.lane.b32.xlu0 %v1199_v3, %s1144_s20  ;;  %224 = vst [vmem:[#allocation2 + $0x8] sm:$0xf] %v1073_v5  ;;  %v1079_v11 = vpack.c.bf16 %v1008_v9, %v1007_v8  ;;  %v1081_v13 = vpack.c.bf16 %v1010_v12, %v1207_v6 }
  0x14   : > { %423 = vst [vmem:[#allocation2 + $0x14] sm:$0xf] %v1080_v7 }
  0x15   : > { %422 = vst [vmem:[#allocation2 + $0xc] sm:$0xff] %v1079_v11 }
  0x17   : > { %246 = vrot.lane.b32.xlu1 %v1074_v10, %s1143_s19  ;;  %231 = vrot.lane.b32.xlu0 %v1074_v10, %s1144_s20 }
  0x1b   : > { %278 = vrot.lane.b32.xlu1 %v1074_v10, %s1145_s21  ;;  %276 = vrot.lane.b32.xlu0 %v1199_v3, %s1145_s21 }
  0x1f   : > { %292 = vrot.lane.b32.xlu1 %v1074_v10, %s1146_s22  ;;  %290 = vrot.lane.b32.xlu0 %v1199_v3, %s1146_s22 }
  0x23   : > { %306 = vrot.lane.b32.xlu1 %v1074_v10, %s1147_s23  ;;  %304 = vrot.lane.b32.xlu0 %v1199_v3, %s1147_s23 }
  0x27   : > { %338 = vrot.lane.b32.xlu1 %v1074_v10, %s1148_s24  ;;  %336 = vrot.lane.b32.xlu0 %v1199_v3, %s1148_s24 }
  0x2b   : > { %352 = vrot.lane.b32.xlu1 %v1074_v10, %s1149_s25  ;;  %350 = vrot.lane.b32.xlu0 %v1199_v3, %s1149_s25 }
  0x2f   : > { %366 = vrot.lane.b32.xlu1 %v1074_v10, %s1150_s26  ;;  %364 = vrot.lane.b32.xlu0 %v1199_v3, %s1150_s26 }
  0x33   : > { %430 = vrot.lane.b32.xlu1 %v1081_v13, %s1144_s20  ;;  %428 = vrot.lane.b32.xlu0 %v1079_v11, %s1144_s20 }
  0x37   : > { %443 = vrot.lane.b32.xlu1 %v1081_v13, %s1143_s19  ;;  %441 = vrot.lane.b32.xlu0 %v1079_v11, %s1143_s19 }
  0x3b   : > { %474 = vrot.lane.b32.xlu1 %v1081_v13, %s1145_s21  ;;  %472 = vrot.lane.b32.xlu0 %v1079_v11, %s1145_s21 }
  0x3f   : > { %487 = vrot.lane.b32.xlu1 %v1081_v13, %s1146_s22  ;;  %485 = vrot.lane.b32.xlu0 %v1079_v11, %s1146_s22 }
  0x43   : > { %500 = vrot.lane.b32.xlu1 %v1081_v13, %s1147_s23  ;;  %498 = vrot.lane.b32.xlu0 %v1079_v11, %s1147_s23 }
  0x47   : > { %531 = vrot.lane.b32.xlu1 %v1081_v13, %s1148_s24  ;;  %529 = vrot.lane.b32.xlu0 %v1079_v11, %s1148_s24 }
  0x4b   : > { %544 = vrot.lane.b32.xlu1 %v1081_v13, %s1149_s25  ;;  %542 = vrot.lane.b32.xlu0 %v1079_v11, %s1149_s25 }
  0x4f   : > { %557 = vrot.lane.b32.xlu1 %v1081_v13, %s1150_s26  ;;  %555 = vrot.lane.b32.xlu0 %v1079_v11, %s1150_s26 }
  0x53   : > { %606 = vperm.xlu1 %1105, %v598_v15   ;;  %601 = vperm.xlu0 %1104, %v597_v16  }
  0x57   : > { %188 = vrot.lane.b32.xlu1 %v1189_v0, %s1146_s22  ;;  %190 = vrot.lane.b32.xlu0 %v1192_v1, %s1146_s22 }
  0x5b   : > { %192 = vrot.lane.b32.xlu1 %v1195_v2, %s1146_s22  ;;  %194 = vrot.lane.b32.xlu0 %v1202_v4, %s1146_s22 }
  0x5f   : > { %387 = vrot.lane.b32.xlu1 %v1007_v8, %s1146_s22  ;;  %389 = vrot.lane.b32.xlu0 %v1008_v9, %s1146_s22 }
  0x63   : > { %391 = vrot.lane.b32.xlu1 %v1207_v6, %s1146_s22  ;;  %393 = vrot.lane.b32.xlu0 %v1010_v12, %s1146_s22 }
  0x85   : > { %v245_v17 = vpop.permute.xlu1 %244  ;;  %v230_v18 = vpop.permute.xlu0 %229 }
  0x86   : > { %v248_v21 = vrot.slane %v245_v17, 4  ;;  %v233_v22 = vrot.slane %v230_v18, 4 }
  0x89   : > { %v247_v19 = vpop.permute.xlu1 %246  ;;  %v232_v20 = vpop.permute.xlu0 %231 }
  0x8a   : > { %v249_v23 = vrot.slane %v247_v19, 4  ;;  %v234_v24 = vrot.slane %v232_v20, 4 }
  0x8c   : > { %v250_v25 = vsel %vm235_vm0, %v248_v21, %v249_v23  ;;  %v253_v26 = vsel %vm251_vm1, %v247_v19, %v249_v23  ;;  %v236_v27 = vsel %vm235_vm0, %v233_v22, %v234_v24  ;;  %v239_v28 = vsel %vm237_vm2, %v232_v20, %v234_v24 }
  0x8d   : > { %v252_v29 = vsel %vm251_vm1, %v245_v17, %v250_v25  ;;  %257 = vst [vmem:[#allocation2 + $0x38] sm:$0xf] %v253_v26  ;;  %v238_v30 = vsel %vm237_vm2, %v230_v18, %v236_v27  ;;  %243 = vst [vmem:[#allocation2 + $0x20] sm:$0xf] %v239_v28  ;;  %v279_v31 = vpop.permute.xlu1 %278  ;;  %v277_v32 = vpop.permute.xlu0 %276  ;;  %v1289_v27 = vld [vmem:[%s1358_s1] sm:$0xff]  }
  0x8e   : > { %v281_v33 = vrot.slane %v279_v31, 4  ;;  %v280_v34 = vrot.slane %v277_v32, 4  ;;  %v1028_v35 = vcombine.high %v1199_v3, %v238_v30  ;;  %v1027_v36 = vcombine.low %v1199_v3, %v238_v30 }
  0x90   : > { %v285_v37 = vsel %vm283_vm3, %v279_v31, %v281_v33  ;;  %v282_v38 = vsel %vm235_vm0, %v280_v34, %v281_v33  ;;  %772 = vmatprep.subr.bf16.mxu0 %v1028_v35 }
  0x91   : > { %289 = vst [vmem:[#allocation2 + $0x50] sm:$0xf] %v285_v37  ;;  %v284_v39 = vsel %vm283_vm3, %v277_v32, %v282_v38  ;;  %v293_v40 = vpop.permute.xlu1 %292  ;;  %v291_v41 = vpop.permute.xlu0 %290  ;;  %773 = vmatpush1.bf16.msra.mxu0 %v1027_v36 }
  0x92   : > { %v295_v42 = vrot.slane %v293_v40, 4  ;;  %v294_v43 = vrot.slane %v291_v41, 4  ;;  %v1034_v44 = vcombine.high %v252_v29, %v284_v39  ;;  %v1033_v45 = vcombine.low %v252_v29, %v284_v39 }
  0x94   : > { %v299_v46 = vsel %vm196_vm4, %v293_v40, %v295_v42  ;;  %v296_v47 = vsel %vm235_vm0, %v294_v43, %v295_v42  ;;  %774 = vmatprep.subr.bf16.mxu0 %v1034_v44 }
  0x95   : > { %303 = vst [vmem:[#allocation2 + $0x68] sm:$0xf] %v299_v46  ;;  %v298_v48 = vsel %vm196_vm4, %v291_v41, %v296_v47  ;;  %v307_v49 = vpop.permute.xlu1 %306  ;;  %v305_v50 = vpop.permute.xlu0 %304  ;;  %775 = vmatpush1.bf16.msra.mxu0 %v1033_v45 }
  0x96   : > { %v309_v51 = vrot.slane %v307_v49, 4  ;;  %v308_v52 = vrot.slane %v305_v50, 4 }
  0x98   : > { %v313_v53 = vsel %vm311_vm5, %v307_v49, %v309_v51  ;;  %v310_v54 = vsel %vm235_vm0, %v308_v52, %v309_v51 }
  0x99   : > { %317 = vst [vmem:[#allocation2 + $0x80] sm:$0xf] %v313_v53  ;;  %v312_v55 = vsel %vm311_vm5, %v305_v50, %v310_v54  ;;  %v339_v56 = vpop.permute.xlu1 %338  ;;  %v337_v57 = vpop.permute.xlu0 %336 }
  0x9a   : > { %v341_v58 = vrot.slane %v339_v56, 4  ;;  %v340_v59 = vrot.slane %v337_v57, 4  ;;  %v1040_v60 = vcombine.high %v298_v48, %v312_v55  ;;  %v1039_v61 = vcombine.low %v298_v48, %v312_v55 }
  0x9c   : > { %v345_v62 = vsel %vm343_vm6, %v339_v56, %v341_v58  ;;  %v342_v63 = vsel %vm235_vm0, %v340_v59, %v341_v58  ;;  %776 = vmatprep.subr.bf16.mxu0 %v1040_v60 }
  0x9d   : > { %349 = vst [vmem:[#allocation2 + $0x98] sm:$0xf] %v345_v62  ;;  %v344_v0 = vsel %vm343_vm6, %v337_v57, %v342_v63  ;;  %v353_v1 = vpop.permute.xlu1 %352  ;;  %v351_v2 = vpop.permute.xlu0 %350  ;;  %777 = vmatpush1.bf16.msra.mxu0 %v1039_v61 }
  0x9e   : > { %v355_v3 = vrot.slane %v353_v1, 4  ;;  %v354_v4 = vrot.slane %v351_v2, 4 }
  0xa0   : > { %v359_v5 = vsel %vm357_vm7, %v353_v1, %v355_v3  ;;  %v356_v6 = vsel %vm235_vm0, %v354_v4, %v355_v3  ;;  %v1118_v3 = vld [vmem:[#allocation2 + $0x38] ss:$24 sps:$4 sm:$0xff]  }
  0xa1   : > { %363 = vst [vmem:[#allocation2 + $0xb0] sm:$0xf] %v359_v5  ;;  %v358_v7 = vsel %vm357_vm7, %v351_v2, %v356_v6  ;;  %v367_v8 = vpop.permute.xlu1 %366  ;;  %v365_v9 = vpop.permute.xlu0 %364 }
  0xa2   : > { %v369_v10 = vrot.slane %v367_v8, 4  ;;  %v368_v11 = vrot.slane %v365_v9, 4  ;;  %v1046_v12 = vcombine.high %v344_v0, %v358_v7  ;;  %v1045_v13 = vcombine.low %v344_v0, %v358_v7 }
  0xa4   : > { %v373_v15 = vsel %vm371_vm8, %v367_v8, %v369_v10  ;;  %v370_v16 = vsel %vm235_vm0, %v368_v11, %v369_v10  ;;  %778 = vmatprep.subr.bf16.mxu0 %v1046_v12 }
  0xa5   : > { %377 = vst [vmem:[#allocation2 + $0xc8] sm:$0xf] %v373_v15  ;;  %v372_v17 = vsel %vm371_vm8, %v365_v9, %v370_v16  ;;  %v431_v18 = vpop.permute.xlu1 %430  ;;  %v429_v19 = vpop.permute.xlu0 %428  ;;  %779 = vmatpush1.bf16.msra.mxu0 %v1045_v13 }
  0xa6   : > { %v433_v20 = vrot.slane %v431_v18, 4  ;;  %v432_v21 = vrot.slane %v429_v19, 4  ;;  %v1052_v22 = vcombine.high %v372_v17, %v372_v17  ;;  %v1051_v23 = vcombine.low %v372_v17, %v372_v17 }
  0xa8   : > { %v436_v24 = vsel %vm237_vm2, %v431_v18, %v433_v20  ;;  %v434_v25 = vsel %vm235_vm0, %v432_v21, %v433_v20  ;;  %1057 = vmatprep.subr.msk.bf16.mxu0 %vm235_vm0, %v1052_v22  ;;  %v755_v26 = vsel %vm235_vm0, %v1051_v23, 0  ;;  %v1124_v22 = vld [vmem:[#allocation2 + $0x68] ss:$24 sps:$4 sm:$0xff]  }
  0xa9   : > { %440 = vst [vmem:[#allocation2 + $0x2c] sm:$0xf] %v436_v24  ;;  %v435_v28 = vsel %vm237_vm2, %v429_v19, %v434_v25  ;;  %v444_v29 = vpop.permute.xlu1 %443  ;;  %v442_v30 = vpop.permute.xlu0 %441  ;;  %781 = vmatpush1.bf16.msra.mxu0 %v755_v26 }
  0xaa   : > { %439 = vst [vmem:[#allocation2 + $0x24] sm:$0xff] %v435_v28  ;;  %v446_v31 = vrot.slane %v444_v29, 4  ;;  %v445_v32 = vrot.slane %v442_v30, 4 }
  0xac   : > { %v449_v33 = vsel %vm251_vm1, %v444_v29, %v446_v31  ;;  %v447_v34 = vsel %vm235_vm0, %v445_v32, %v446_v31  ;;  %1058 = vmatmul.mubr.msk.bf16.vlgmr.msra.gmra.mrb[0].mxu0 %vm749_vm9, %v1289_v27 }
  0xad   : > { %453 = vst [vmem:[#allocation2 + $0x44] sm:$0xf] %v449_v33  ;;  %v448_v35 = vsel %vm251_vm1, %v442_v30, %v447_v34  ;;  %v475_v36 = vpop.permute.xlu1 %474  ;;  %v473_v37 = vpop.permute.xlu0 %472  ;;  %890 = vmatprep.mubr.bf16.mxu0 %v1151_v14  ;;  %v1111_v14 = vld [vmem:[#allocation2 + $0x8] ss:$24 sps:$4 sm:$0xff]   ;;  %v1130_v30 = vld [vmem:[#allocation2 + $0x98] ss:$24 sps:$4 sm:$0xff]  }
  0xae   : > { %452 = vst [vmem:[#allocation2 + $0x3c] sm:$0xff] %v448_v35  ;;  %v477_v38 = vrot.slane %v475_v36, 4  ;;  %v476_v39 = vrot.slane %v473_v37, 4 }
  0xb0   : > { %v480_v40 = vsel %vm283_vm3, %v475_v36, %v477_v38  ;;  %v478_v41 = vsel %vm235_vm0, %v476_v39, %v477_v38  ;;  %v1110_v49 = vld [vmem:[#allocation2 + $0x14] ss:$24 sps:$4 sm:$0xff]  }
  0xb1   : > { %484 = vst [vmem:[#allocation2 + $0x5c] sm:$0xf] %v480_v40  ;;  %v479_v42 = vsel %vm283_vm3, %v473_v37, %v478_v41  ;;  %v488_v43 = vpop.permute.xlu1 %487  ;;  %v486_v44 = vpop.permute.xlu0 %485  ;;  %v1106_v45 = vld [vmem:[#allocation2 + $0xc] ss:$24 sps:$4 sm:$0xff]   ;;  %v1108_v48 = vld [vmem:[#allocation2 + $0x10] ss:$24 sps:$4 sm:$0xff]   ;;  %858 = vmatprep.subr.bf16.mxu0 %v1110_v49 }
  0xb2   : > { %483 = vst [vmem:[#allocation2 + $0x54] sm:$0xff] %v479_v42  ;;  %v490_v46 = vrot.slane %v488_v43, 4  ;;  %v489_v47 = vrot.slane %v486_v44, 4  ;;  %815 = vmatprep.subr.bf16.mxu1 %v1106_v45  ;;  %859 = vmatpush1.bf16.msra.mxu0 %v1108_v48 }
  0xb3   : > { %816 = vmatpush1.bf16.msra.mxu1 %v1111_v14 }
  0xb4   : > { %v493_v50 = vsel %vm196_vm4, %v488_v43, %v490_v46  ;;  %v491_v51 = vsel %vm235_vm0, %v489_v47, %v490_v46 }
  0xb5   : > { %497 = vst [vmem:[#allocation2 + $0x74] sm:$0xf] %v493_v50  ;;  %v492_v52 = vsel %vm196_vm4, %v486_v44, %v491_v51  ;;  %v501_v53 = vpop.permute.xlu1 %500  ;;  %v499_v54 = vpop.permute.xlu0 %498 }
  0xb6   : > { %496 = vst [vmem:[#allocation2 + $0x6c] sm:$0xff] %v492_v52  ;;  %v503_v55 = vrot.slane %v501_v53, 4  ;;  %v502_v56 = vrot.slane %v499_v54, 4 }
  0xb8   : > { %v506_v57 = vsel %vm311_vm5, %v501_v53, %v503_v55  ;;  %v504_v58 = vsel %vm235_vm0, %v502_v56, %v503_v55  ;;  %v1117_v2 = vld [vmem:[#allocation2 + $0x44] ss:$24 sps:$4 sm:$0xff]  }
  0xb9   : > { %510 = vst [vmem:[#allocation2 + $0x8c] sm:$0xf] %v506_v57  ;;  %v505_v59 = vsel %vm311_vm5, %v499_v54, %v504_v58  ;;  %v532_v60 = vpop.permute.xlu1 %531  ;;  %v530_v61 = vpop.permute.xlu0 %529  ;;  %v1113_v62 = vld [vmem:[#allocation2 + $0x3c] ss:$24 sps:$4 sm:$0xff]   ;;  %v1115_v1 = vld [vmem:[#allocation2 + $0x40] ss:$24 sps:$4 sm:$0xff]   ;;  %860 = vmatprep.subr.bf16.mxu0 %v1117_v2 }
  0xba   : > { %509 = vst [vmem:[#allocation2 + $0x84] sm:$0xff] %v505_v59  ;;  %v534_v63 = vrot.slane %v532_v60, 4  ;;  %v533_v0 = vrot.slane %v530_v61, 4  ;;  %817 = vmatprep.subr.bf16.mxu1 %v1113_v62  ;;  %861 = vmatpush1.bf16.msra.mxu0 %v1115_v1 }
  0xbb   : > { %818 = vmatpush1.bf16.msra.mxu1 %v1118_v3 }
  0xbc   : > { %v537_v4 = vsel %vm343_vm6, %v532_v60, %v534_v63  ;;  %v535_v5 = vsel %vm235_vm0, %v533_v0, %v534_v63 }
  0xbd   : > { %541 = vst [vmem:[#allocation2 + $0xa4] sm:$0xf] %v537_v4  ;;  %v536_v6 = vsel %vm343_vm6, %v530_v61, %v535_v5  ;;  %v545_v7 = vpop.permute.xlu1 %544  ;;  %v543_v8 = vpop.permute.xlu0 %542 }
  0xbe   : > { %540 = vst [vmem:[#allocation2 + $0x9c] sm:$0xff] %v536_v6  ;;  %v547_v9 = vrot.slane %v545_v7, 4  ;;  %v546_v10 = vrot.slane %v543_v8, 4 }
  0xc0   : > { %v550_v11 = vsel %vm357_vm7, %v545_v7, %v547_v9  ;;  %v548_v12 = vsel %vm235_vm0, %v546_v10, %v547_v9  ;;  %v1123_v21 = vld [vmem:[#allocation2 + $0x74] ss:$24 sps:$4 sm:$0xff]  }
  0xc1   : > { %554 = vst [vmem:[#allocation2 + $0xbc] sm:$0xf] %v550_v11  ;;  %v549_v13 = vsel %vm357_vm7, %v543_v8, %v548_v12  ;;  %v558_v15 = vpop.permute.xlu1 %557  ;;  %v556_v16 = vpop.permute.xlu0 %555  ;;  %v1119_v17 = vld [vmem:[#allocation2 + $0x6c] ss:$24 sps:$4 sm:$0xff]   ;;  %v1121_v20 = vld [vmem:[#allocation2 + $0x70] ss:$24 sps:$4 sm:$0xff]   ;;  %862 = vmatprep.subr.bf16.mxu0 %v1123_v21 }
  0xc2   : > { %553 = vst [vmem:[#allocation2 + $0xb4] sm:$0xff] %v549_v13  ;;  %v560_v18 = vrot.slane %v558_v15, 4  ;;  %v559_v19 = vrot.slane %v556_v16, 4  ;;  %819 = vmatprep.subr.bf16.mxu1 %v1119_v17  ;;  %863 = vmatpush1.bf16.msra.mxu0 %v1121_v20 }
  0xc3   : > { %820 = vmatpush1.bf16.msra.mxu1 %v1124_v22 }
  0xc4   : > { %v563_v23 = vsel %vm371_vm8, %v558_v15, %v560_v18  ;;  %v561_v24 = vsel %vm235_vm0, %v559_v19, %v560_v18 }
  0xc5   : > { %567 = vst [vmem:[#allocation2 + $0xd4] sm:$0xf] %v563_v23  ;;  %v562_v25 = vsel %vm371_vm8, %v556_v16, %v561_v24 }
  0xc6   : > { %566 = vst [vmem:[#allocation2 + $0xcc] sm:$0xff] %v562_v25 }
  0xc8   : > { %v1129_v29 = vld [vmem:[#allocation2 + $0xa4] ss:$24 sps:$4 sm:$0xff]  }
  0xc9   : > { %v1125_v26 = vld [vmem:[#allocation2 + $0x9c] ss:$24 sps:$4 sm:$0xff]   ;;  %v1127_v28 = vld [vmem:[#allocation2 + $0xa0] ss:$24 sps:$4 sm:$0xff]   ;;  %864 = vmatprep.subr.bf16.mxu0 %v1129_v29 }
  0xca   : > { %821 = vmatprep.subr.bf16.mxu1 %v1125_v26  ;;  %865 = vmatpush1.bf16.msra.mxu0 %v1127_v28 }
  0xcb   : > { %822 = vmatpush1.bf16.msra.mxu1 %v1130_v30 }
  0xcd   : > { %v595_v31 = vld [vmem:[#allocation2 + $0xc8] sm:$0xff]  ;;  %v596_v32 = vld [vmem:[#allocation2 + $0xd0] sm:$0xff] }
  0xce   : > { %v1054_v33 = vcombine.high %v595_v31, %v595_v31  ;;  %v1056_v34 = vcombine.high %v596_v32, %v596_v32  ;;  %v1053_v35 = vcombine.low %v595_v31, %v595_v31  ;;  %v1055_v36 = vcombine.low %v596_v32, %v596_v32 }
  0xd0   : > { %1059 = vmatprep.subr.msk.bf16.mxu1 %vm235_vm0, %v1054_v33  ;;  %1061 = vmatprep.subr.msk.bf16.mxu0 %vm235_vm0, %v1056_v34  ;;  %v761_v37 = vsel %vm235_vm0, %v1053_v35, 0  ;;  %v767_v38 = vsel %vm235_vm0, %v1055_v36, 0 }
  0xd1   : > { %824 = vmatpush1.bf16.msra.mxu1 %v761_v37  ;;  %867 = vmatpush1.bf16.msra.mxu0 %v767_v38 }
  0xd2   : > { %v607_v39 = vpop.permute.xlu1 %606  ;;  %v602_v40 = vpop.permute.xlu0 %601 }
  0xd4   : > { %1060 = vmatmul.mubr.msk.bf16.vlgmr.msra.gmra.mrb[0].mxu1 %vm749_vm9, %v1289_v27  ;;  %1062 = vmatmul.mubr.msk.bf16.vlgmr.msra.gmra.mrb[4].mxu0 %vm749_vm9, %v1289_v27 }
  0xd6   : > { %v189_v41 = vpop.permute.xlu1 %188  ;;  %v191_v42 = vpop.permute.xlu0 %190 }
  0xd7   : > { %v197_v43 = vsel %vm196_vm4, %v189_v41, %v191_v42 }
  0xd8   : > { %203 = vst [vmem:[%s1328_s9] sm:$0xff] %v197_v43 }
  0xda   : > { %v193_v27 = vpop.permute.xlu1 %192  ;;  %v195_v44 = vpop.permute.xlu0 %194 }
  0xdb   : > { %v198_v45 = vsel %vm196_vm4, %v191_v42, %v193_v27  ;;  %v199_v46 = vsel %vm196_vm4, %v193_v27, %v195_v44 }
  0xdc   : > { %204 = vst [vmem:[%s1328_s9 + $0x8] sm:$0xff] %v198_v45  ;;  %205 = vst [vmem:[%s1328_s9 + $0x10] sm:$0xff] %v199_v46 }
  0xde   : > { %v388_v47 = vpop.permute.xlu1 %387  ;;  %v390_v48 = vpop.permute.xlu0 %389 }
  0xdf   : > { %v395_v14 = vsel %vm196_vm4, %v388_v47, %v390_v48 }
  0xe0   : > { %1004 = vst [vmem:[%s1328_s9 + $0x48] sm:$0xff] %v395_v14 }
  0xe2   : > { %v392_v49 = vpop.permute.xlu1 %391  ;;  %v394_v51 = vpop.permute.xlu0 %393 }
  0xe3   : > { %v396_v50 = vsel %vm196_vm4, %v390_v48, %v392_v49  ;;  %v397_v52 = vsel %vm196_vm4, %v392_v49, %v394_v51 }
  0xe4   : > { %1005 = vst [vmem:[%s1328_s9 + $0x50] sm:$0xff] %v396_v50  ;;  %1006 = vst [vmem:[%s1328_s9 + $0x58] sm:$0xff] %v397_v52 }
 0x17f   : > { %v806_v53 = vpop.f32.mrb[0].mxu0 }
 0x180   : > { %v808_v54 = vpop.f32.mrb[1].mxu0  ;;  %v807_v55 = vadd.f32 %v806_v53, %v602_v40 }
 0x181   : > { %v810_v56 = vpop.f32.mrb[2].mxu0  ;;  %v809_v57 = vadd.f32 %v808_v54, %v602_v40 }
 0x182   : > { %v812_v58 = vpop.f32.mrb[3].mxu0  ;;  %v901_v59 = vmax.f32 %v807_v55, 0.0  ;;  %v811_v60 = vadd.f32 %v810_v56, %v607_v39 }
 0x183   : > { %v813_v61 = vadd.f32 %v812_v58, %v607_v39  ;;  %v902_v62 = vmax.f32 %v809_v57, 0.0 }
 0x184   : > { %913 = vst [vmem:[%s1328_s9 + $0x18] sm:$0xff] %v901_v59  ;;  %v907_v63 = vmax.f32 %v811_v60, 0.0 }
 0x185   : > { %v908_v0 = vmax.f32 %v813_v61, 0.0  ;;  %914 = vst [vmem:[%s1328_s9 + $0x20] sm:$0xff] %v902_v62 }
 0x186   : > { %916 = vst [vmem:[%s1328_s9 + $0x30] sm:$0xff] %v907_v63 }
 0x187   : > { %917 = vst [vmem:[%s1328_s9 + $0x38] sm:$0xff] %v908_v0 }
 0x1a7   : > { %v849_v1 = vpop.f32.mrb[0].mxu1  ;;  %v892_v2 = vpop.f32.mrb[4].mxu0 }
 0x1a8   : > { %v850_v3 = vadd.f32 %v849_v1, %v602_v40  ;;  %v893_v4 = vadd.f32 %v892_v2, %v602_v40  ;;  %v851_v5 = vpop.f32.mrb[1].mxu1  ;;  %v894_v6 = vpop.f32.mrb[5].mxu0 }
 0x1a9   : > { %v852_v7 = vadd.f32 %v851_v5, %v602_v40  ;;  %v895_v8 = vadd.f32 %v894_v6, %v602_v40  ;;  %v853_v9 = vpop.f32.mrb[2].mxu1  ;;  %v896_v10 = vpop.f32.mrb[6].mxu0 }
 0x1aa   : > { %v903_v11 = vmax.f32 %v850_v3, 0.0  ;;  %v905_v12 = vmax.f32 %v893_v4, 0.0  ;;  %v854_v13 = vadd.f32 %v853_v9, %v607_v39  ;;  %v897_v15 = vadd.f32 %v896_v10, %v607_v39  ;;  %v855_v16 = vpop.f32.mrb[3].mxu1  ;;  %v898_v17 = vpop.f32.mrb[7].mxu0 }
 0x1ab   : > { %v904_v18 = vmax.f32 %v852_v7, 0.0  ;;  %v906_v19 = vmax.f32 %v895_v8, 0.0  ;;  %v856_v20 = vadd.f32 %v855_v16, %v607_v39  ;;  %v899_v21 = vadd.f32 %v898_v17, %v607_v39 }
 0x1ac   : > { %915 = vst [vmem:[%s1328_s9 + $0x28] sm:$0xff] %v903_v11  ;;  %1064 = vst [vmem:[%s1328_s9 + $0x68] sm:$0xff] %v905_v12  ;;  %v909_v22 = vmax.f32 %v854_v13, 0.0  ;;  %v911_v23 = vmax.f32 %v897_v15, 0.0 }
 0x1ad   : > { %1063 = vst [vmem:[%s1328_s9 + $0x60] sm:$0xff] %v904_v18  ;;  %1065 = vst [vmem:[%s1328_s9 + $0x70] sm:$0xff] %v906_v19  ;;  %v910_v24 = vmax.f32 %v856_v20, 0.0  ;;  %v912_v25 = vmax.f32 %v899_v21, 0.0 }
 0x1ae   : > { %918 = vst [vmem:[%s1328_s9 + $0x40] sm:$0xff] %v909_v22  ;;  %1067 = vst [vmem:[%s1328_s9 + $0x80] sm:$0xff] %v911_v23 }
 0x1af   : > { %1066 = vst [vmem:[%s1328_s9 + $0x78] sm:$0xff] %v910_v24  ;;  %1068 = vst [vmem:[%s1328_s9 + $0x88] sm:$0xff] %v912_v25 }
 0x1b0 PF: > { %s13_s12 = sadd.s32 1, %s1141_s12  }
 0x1b1   : > { %p10_p4 = scmp.ge.s32.totalorder %s13_s12, 4  }
 0x1b3   :  { %12 = sbr.rel (!%p10_p4) target bundleno = 1 (0x1), region = 64 }

</bundles_post_ra>
